<compile_context>
chip_gen: v5e
topology: v5e:2x2
jax: 0.10.0
libtpu: 0.0.40
codegen_flags: <defaults>
</compile_context>

<pallas_src>
import math
import functools
import jax
import jax.numpy as jnp
from jax.experimental import pallas as pl
from jax.experimental.pallas import tpu as pltpu

ENC_IN = 121
ENC_OUT = 64
FUSED_IN = 3 * ENC_IN        # 363
FUSED_IN_PAD = 384           # next multiple of 128
FUSED_OUT = 3 * ENC_OUT      # 192
H1 = 256
H2 = 128
N_ACTIONS = 9
OUT_PAD = 128                # lane-dense output width


def _round_up(x, m):
    return (x + m - 1) // m * m


# ---------------------------------------------------------------------------
# Kernel
# ---------------------------------------------------------------------------
def general_network_kernel(
    x_ref, valid_ref,
    wenc_ref, benc_ref,
    w1_ref, b1_ref,
    w2_ref, b2_ref,
    wo_ref, bo_ref,
    out_ref,
):
    # Fused block-diagonal encoder: (tile_b,384)@(384,192), bias + tanh in f32.
    h = jnp.dot(x_ref[...], wenc_ref[...], preferred_element_type=jnp.float32)
    h = jnp.tanh(h + benc_ref[...])

    # fc1: 192 -> 256, tanh
    h = jnp.dot(h.astype(jnp.bfloat16), w1_ref[...], preferred_element_type=jnp.float32)
    h = jnp.tanh(h + b1_ref[...])

    # fc2: 256 -> 128, tanh
    h = jnp.dot(h.astype(jnp.bfloat16), w2_ref[...], preferred_element_type=jnp.float32)
    h = jnp.tanh(h + b2_ref[...])

    # output: 128 -> 128 (lanes 0..8 real, rest zero-padded weights)
    logits = jnp.dot(h.astype(jnp.bfloat16), wo_ref[...], preferred_element_type=jnp.float32)
    logits = logits + bo_ref[...]

    # x[valid_moves == 0] = -1e6  (valid is pre-padded to 128 lanes; pad lanes are sliced away)
    logits = jnp.where(valid_ref[...] == 0.0, jnp.float32(-1000000.0), logits)
    out_ref[...] = logits


# ---------------------------------------------------------------------------
# Wrapper
# ---------------------------------------------------------------------------
@functools.partial(jax.jit, static_argnames=("tile_b",))
def general_network_forward(bot, crew, ship, valid_moves, packed, tile_b=256):
    B = bot.shape[0]
    tile_b = min(tile_b, _round_up(B, 8))   # keep tiny batches cheap
    Bp = _round_up(B, tile_b)

    # Concatenate encoders' inputs, pad K 363->384 and batch B->Bp, cast to bf16 for the MXU.
    x = jnp.concatenate([bot, crew, ship], axis=1)
    x = jnp.pad(x, ((0, Bp - B), (0, FUSED_IN_PAD - FUSED_IN))).astype(jnp.bfloat16)
    # Pad valid mask to lane-dense 128 (pad lanes = 1.0 so nothing extra is masked; sliced away).
    valid = jnp.pad(
        valid_moves.astype(jnp.float32),
        ((0, Bp - B), (0, OUT_PAD - N_ACTIONS)),
        constant_values=1.0,
    )

    grid = (Bp // tile_b,)
    batch_spec = lambda n: pl.BlockSpec((tile_b, n), lambda i: (i, 0))
    resident = lambda shape: pl.BlockSpec(shape, lambda i: (0, 0))  # weights: DMA'd once

    flops = 2 * Bp * (FUSED_IN_PAD * FUSED_OUT + FUSED_OUT * H1 + H1 * H2 + H2 * OUT_PAD)
    transcendentals = Bp * (FUSED_OUT + H1 + H2)
    bytes_accessed = (
        x.size * 2 + valid.size * 4 + Bp * OUT_PAD * 4
        + sum(int(v.size) * v.dtype.itemsize for v in packed.values())
    )

    out_padded = pl.pallas_call(
        general_network_kernel,
        out_shape=jax.ShapeDtypeStruct((Bp, OUT_PAD), jnp.float32),
        grid=grid,
        in_specs=[
            batch_spec(FUSED_IN_PAD),                 # x
            batch_spec(OUT_PAD),                      # valid mask
            resident((FUSED_IN_PAD, FUSED_OUT)),      # fused encoder W (bf16)
            resident((1, FUSED_OUT)),                 # fused encoder b (f32)
            resident((FUSED_OUT, H1)),                # fc1 W
            resident((1, H1)),                        # fc1 b
            resident((H1, H2)),                       # fc2 W
            resident((1, H2)),                        # fc2 b
            resident((H2, OUT_PAD)),                  # output W (N padded to 128)
            resident((1, OUT_PAD)),                   # output b
        ],
        out_specs=batch_spec(OUT_PAD),
        compiler_params=pltpu.CompilerParams(dimension_semantics=("parallel",)),
        cost_estimate=pl.CostEstimate(
            flops=flops, transcendentals=transcendentals, bytes_accessed=bytes_accessed
        ),
    )(
        x, valid,
        packed["w_enc"], packed["b_enc"],
        packed["w1"], packed["b1"],
        packed["w2"], packed["b2"],
        packed["wo"], packed["bo"],
    )
    return out_padded[:B, :N_ACTIONS]


# ---------------------------------------------------------------------------
# Parameter construction / packing
# ---------------------------------------------------------------------------
def init_linear(key, fan_in, fan_out):
    # PyTorch nn.Linear default init (uniform +-1/sqrt(fan_in)), stored as (in, out).
    kw, kb = jax.random.split(key)
    bound = 1.0 / math.sqrt(fan_in)
    w = jax.random.uniform(kw, (fan_in, fan_out), jnp.float32, -bound, bound)
    b = jax.random.uniform(kb, (1, fan_out), jnp.float32, -bound, bound)
    return w, b


def make_params(key):
    keys = jax.random.split(key, 6)
    wb, bb = init_linear(keys[0], ENC_IN, ENC_OUT)
    wc, bc = init_linear(keys[1], ENC_IN, ENC_OUT)
    ws, bs = init_linear(keys[2], ENC_IN, ENC_OUT)
    w1, b1 = init_linear(keys[3], FUSED_OUT, H1)
    w2, b2 = init_linear(keys[4], H1, H2)
    wo, bo = init_linear(keys[5], H2, N_ACTIONS)
    return dict(wb=wb, bb=bb, wc=wc, bc=bc, ws=ws, bs=bs,
                w1=w1, b1=b1, w2=w2, b2=b2, wo=wo, bo=bo)


def pack_params(p):
    """Block-diagonal encoder fusion + lane padding + bf16 weight cast (done once)."""
    w_enc = jnp.zeros((FUSED_IN_PAD, FUSED_OUT), jnp.float32)
    w_enc = w_enc.at[0:ENC_IN, 0:ENC_OUT].set(p["wb"])
    w_enc = w_enc.at[ENC_IN:2 * ENC_IN, ENC_OUT:2 * ENC_OUT].set(p["wc"])
    w_enc = w_enc.at[2 * ENC_IN:3 * ENC_IN, 2 * ENC_OUT:3 * ENC_OUT].set(p["ws"])
    b_enc = jnp.concatenate([p["bb"], p["bc"], p["bs"]], axis=1)

    wo = jnp.zeros((H2, OUT_PAD), jnp.float32).at[:, :N_ACTIONS].set(p["wo"])
    bo = jnp.zeros((1, OUT_PAD), jnp.float32).at[:, :N_ACTIONS].set(p["bo"])

    return dict(
        w_enc=w_enc.astype(jnp.bfloat16), b_enc=b_enc,
        w1=p["w1"].astype(jnp.bfloat16), b1=p["b1"],
        w2=p["w2"].astype(jnp.bfloat16), b2=p["b2"],
        wo=wo.astype(jnp.bfloat16), bo=bo,
    )


# ---------------------------------------------------------------------------
# References
# ---------------------------------------------------------------------------
def reference_forward_packed(bot, crew, ship, valid_moves, packed):
    """Pure-JAX reference with identical bf16 casts / fused weights as the kernel."""
    x = jnp.concatenate([bot, crew, ship], axis=1)
    x = jnp.pad(x, ((0, 0), (0, FUSED_IN_PAD - FUSED_IN))).astype(jnp.bfloat16)
    h = jnp.tanh(jnp.dot(x, packed["w_enc"], preferred_element_type=jnp.float32) + packed["b_enc"])
    h = jnp.tanh(jnp.dot(h.astype(jnp.bfloat16), packed["w1"],
                         preferred_element_type=jnp.float32) + packed["b1"])
    h = jnp.tanh(jnp.dot(h.astype(jnp.bfloat16), packed["w2"],
                         preferred_element_type=jnp.float32) + packed["b2"])
    logits = jnp.dot(h.astype(jnp.bfloat16), packed["wo"],
                     preferred_element_type=jnp.float32) + packed["bo"]
    logits = logits[:, :N_ACTIONS]
    return jnp.where(valid_moves == 0.0, -1000000.0, logits)


def reference_forward_f32(bot, crew, ship, valid_moves, p):
    """Full-f32 reference matching the original PyTorch module."""
    be = bot @ p["wb"] + p["bb"]
    ce = crew @ p["wc"] + p["bc"]
    se = ship @ p["ws"] + p["bs"]
    x = jnp.tanh(jnp.concatenate([be, ce, se], axis=1))
    x = jnp.tanh(x @ p["w1"] + p["b1"])
    x = jnp.tanh(x @ p["w2"] + p["b2"])
    x = x @ p["wo"] + p["bo"]
    return jnp.where(valid_moves == 0.0, -1000000.0, x)


# TODO(synk): the torch module's host-side torch.isnan asserts and the (unused-in-forward)
# Categorical action space are not representable inside the kernel and are omitted.

if __name__ == "__main__":
    key = jax.random.PRNGKey(0)
    k_params, k_bot, k_crew, k_ship, k_valid = jax.random.split(key, 5)

    B = 8
    params = make_params(k_params)
    packed = pack_params(params)
    bot = jax.random.normal(k_bot, (B, ENC_IN), jnp.float32)
    crew = jax.random.normal(k_crew, (B, ENC_IN), jnp.float32)
    ship = jax.random.normal(k_ship, (B, ENC_IN), jnp.float32)
    valid_moves = jax.random.bernoulli(k_valid, 0.7, (B, N_ACTIONS)).astype(jnp.float32)

    out = general_network_forward(bot, crew, ship, valid_moves, packed)
    out = jax.block_until_ready(out)
    assert out.shape == (B, N_ACTIONS)

    # Exact-semantics check (same bf16/fused math as the kernel).
    ref_bf16 = reference_forward_packed(bot, crew, ship, valid_moves, packed)
    assert jnp.allclose(out, ref_bf16, atol=5e-3, rtol=5e-3), \
        float(jnp.max(jnp.abs(out - ref_bf16)))

    # Sanity check against the full-f32 original-module reference (bf16 matmul tolerance).
    ref_f32 = reference_forward_f32(bot, crew, ship, valid_moves, params)
    assert jnp.allclose(out, ref_f32, atol=1e-1), \
        float(jnp.max(jnp.abs(out - ref_f32)))

    # Exercise a larger, multi-tile batch (ragged last tile handled by wrapper padding).
    B2 = 300
    kb2, kc2, ks2, kv2 = jax.random.split(jax.random.PRNGKey(1), 4)
    bot2 = jax.random.normal(kb2, (B2, ENC_IN), jnp.float32)
    crew2 = jax.random.normal(kc2, (B2, ENC_IN), jnp.float32)
    ship2 = jax.random.normal(ks2, (B2, ENC_IN), jnp.float32)
    valid2 = jax.random.bernoulli(kv2, 0.7, (B2, N_ACTIONS)).astype(jnp.float32)
    out2 = jax.block_until_ready(general_network_forward(bot2, crew2, ship2, valid2, packed))
    assert out2.shape == (B2, N_ACTIONS)
    ref2 = reference_forward_packed(bot2, crew2, ship2, valid2, packed)
    assert jnp.allclose(out2, ref2, atol=5e-3, rtol=5e-3)

    print("KERNEL_OK")
</pallas_src>

<mosaic_0001>
module attributes {stable_mosaic.version = 11 : i64} {
  func.func @general_network_kernel(%arg0: i32, %arg1: memref<8x384xbf16, #tpu.memory_space<vmem>>, %arg2: memref<8x128xf32, #tpu.memory_space<vmem>>, %arg3: memref<384x192xbf16, #tpu.memory_space<vmem>>, %arg4: memref<1x192xf32, #tpu.memory_space<vmem>>, %arg5: memref<192x256xbf16, #tpu.memory_space<vmem>>, %arg6: memref<1x256xf32, #tpu.memory_space<vmem>>, %arg7: memref<256x128xbf16, #tpu.memory_space<vmem>>, %arg8: memref<1x128xf32, #tpu.memory_space<vmem>>, %arg9: memref<128x128xbf16, #tpu.memory_space<vmem>>, %arg10: memref<1x128xf32, #tpu.memory_space<vmem>>, %arg11: memref<8x128xf32, #tpu.memory_space<vmem>>) attributes {dimension_semantics = [#tpu.dimension_semantics<parallel>], iteration_bounds = array<i64: 1>, scalar_prefetch = 0 : i64, scratch_operands = 0 : i64, tpu.core_type = #tpu.core_type<tc>, window_params = [{transform_indices = @transform_0, window_bounds = array<i64: 8, 384>}, {transform_indices = @transform_1, window_bounds = array<i64: 8, 128>}, {pipeline_mode = #tpu.pipeline_mode<synchronous>, transform_indices = @transform_2, window_bounds = array<i64: 384, 192>}, {pipeline_mode = #tpu.pipeline_mode<synchronous>, transform_indices = @transform_3, window_bounds = array<i64: 1, 192>}, {pipeline_mode = #tpu.pipeline_mode<synchronous>, transform_indices = @transform_4, window_bounds = array<i64: 192, 256>}, {pipeline_mode = #tpu.pipeline_mode<synchronous>, transform_indices = @transform_5, window_bounds = array<i64: 1, 256>}, {pipeline_mode = #tpu.pipeline_mode<synchronous>, transform_indices = @transform_6, window_bounds = array<i64: 256, 128>}, {pipeline_mode = #tpu.pipeline_mode<synchronous>, transform_indices = @transform_7, window_bounds = array<i64: 1, 128>}, {pipeline_mode = #tpu.pipeline_mode<synchronous>, transform_indices = @transform_8, window_bounds = array<i64: 128, 128>}, {pipeline_mode = #tpu.pipeline_mode<synchronous>, transform_indices = @transform_9, window_bounds = array<i64: 1, 128>}, {transform_indices = @transform_10, window_bounds = array<i64: 8, 128>}]} {
    %c0 = arith.constant 0 : index
    %c0_0 = arith.constant 0 : index
    %0 = vector.load %arg1[%c0, %c0_0] : memref<8x384xbf16, #tpu.memory_space<vmem>>, vector<8x384xbf16>
    %c0_1 = arith.constant 0 : index
    %c0_2 = arith.constant 0 : index
    %1 = vector.load %arg3[%c0_1, %c0_2] : memref<384x192xbf16, #tpu.memory_space<vmem>>, vector<384x192xbf16>
    %cst = arith.constant dense<0.000000e+00> : vector<8x192xf32>
    %2 = tpu.matmul %0, %1, %cst {dimension_numbers = #tpu.dot_dimension_numbers<[1], [0], [0], [1], [0, 0, 1, 1], [], []>} : vector<8x384xbf16>, vector<384x192xbf16>, vector<8x192xf32> -> vector<8x192xf32>
    %c0_3 = arith.constant 0 : index
    %c0_4 = arith.constant 0 : index
    %3 = vector.load %arg4[%c0_3, %c0_4] : memref<1x192xf32, #tpu.memory_space<vmem>>, vector<1x192xf32>
    %4 = vector.broadcast %3 : vector<1x192xf32> to vector<8x192xf32>
    %5 = arith.addf %2, %4 : vector<8x192xf32>
    %6 = math.tanh %5 : vector<8x192xf32>
    %7 = arith.truncf %6 : vector<8x192xf32> to vector<8x192xbf16>
    %c0_5 = arith.constant 0 : index
    %c0_6 = arith.constant 0 : index
    %8 = vector.load %arg5[%c0_5, %c0_6] : memref<192x256xbf16, #tpu.memory_space<vmem>>, vector<192x256xbf16>
    %cst_7 = arith.constant dense<0.000000e+00> : vector<8x256xf32>
    %9 = tpu.matmul %7, %8, %cst_7 {dimension_numbers = #tpu.dot_dimension_numbers<[1], [0], [0], [1], [0, 0, 1, 1], [], []>} : vector<8x192xbf16>, vector<192x256xbf16>, vector<8x256xf32> -> vector<8x256xf32>
    %c0_8 = arith.constant 0 : index
    %c0_9 = arith.constant 0 : index
    %10 = vector.load %arg6[%c0_8, %c0_9] : memref<1x256xf32, #tpu.memory_space<vmem>>, vector<1x256xf32>
    %11 = vector.broadcast %10 : vector<1x256xf32> to vector<8x256xf32>
    %12 = arith.addf %9, %11 : vector<8x256xf32>
    %13 = math.tanh %12 : vector<8x256xf32>
    %14 = arith.truncf %13 : vector<8x256xf32> to vector<8x256xbf16>
    %c0_10 = arith.constant 0 : index
    %c0_11 = arith.constant 0 : index
    %15 = vector.load %arg7[%c0_10, %c0_11] : memref<256x128xbf16, #tpu.memory_space<vmem>>, vector<256x128xbf16>
    %cst_12 = arith.constant dense<0.000000e+00> : vector<8x128xf32>
    %16 = tpu.matmul %14, %15, %cst_12 {dimension_numbers = #tpu.dot_dimension_numbers<[1], [0], [0], [1], [0, 0, 1, 1], [], []>} : vector<8x256xbf16>, vector<256x128xbf16>, vector<8x128xf32> -> vector<8x128xf32>
    %c0_13 = arith.constant 0 : index
    %c0_14 = arith.constant 0 : index
    %17 = vector.load %arg8[%c0_13, %c0_14] : memref<1x128xf32, #tpu.memory_space<vmem>>, vector<1x128xf32>
    %18 = vector.broadcast %17 : vector<1x128xf32> to vector<8x128xf32>
    %19 = arith.addf %16, %18 : vector<8x128xf32>
    %20 = math.tanh %19 : vector<8x128xf32>
    %21 = arith.truncf %20 : vector<8x128xf32> to vector<8x128xbf16>
    %c0_15 = arith.constant 0 : index
    %c0_16 = arith.constant 0 : index
    %22 = vector.load %arg9[%c0_15, %c0_16] : memref<128x128xbf16, #tpu.memory_space<vmem>>, vector<128x128xbf16>
    %cst_17 = arith.constant dense<0.000000e+00> : vector<8x128xf32>
    %23 = tpu.matmul %21, %22, %cst_17 {dimension_numbers = #tpu.dot_dimension_numbers<[1], [0], [0], [1], [0, 0, 1, 1], [], []>} : vector<8x128xbf16>, vector<128x128xbf16>, vector<8x128xf32> -> vector<8x128xf32>
    %c0_18 = arith.constant 0 : index
    %c0_19 = arith.constant 0 : index
    %24 = vector.load %arg10[%c0_18, %c0_19] : memref<1x128xf32, #tpu.memory_space<vmem>>, vector<1x128xf32>
    %25 = vector.broadcast %24 : vector<1x128xf32> to vector<8x128xf32>
    %26 = arith.addf %23, %25 : vector<8x128xf32>
    %c0_20 = arith.constant 0 : index
    %c0_21 = arith.constant 0 : index
    %27 = vector.load %arg2[%c0_20, %c0_21] : memref<8x128xf32, #tpu.memory_space<vmem>>, vector<8x128xf32>
    %cst_22 = arith.constant 0.000000e+00 : f32
    %28 = vector.broadcast %cst_22 : f32 to vector<8x128xf32>
    %29 = arith.cmpf oeq, %27, %28 : vector<8x128xf32>
    %cst_23 = arith.constant -1.000000e+06 : f32
    %30 = vector.broadcast %cst_23 : f32 to vector<8x128xf32>
    %31 = arith.select %29, %30, %26 : vector<8x128xi1>, vector<8x128xf32>
    %c0_24 = arith.constant 0 : index
    %c0_25 = arith.constant 0 : index
    %32 = vector.load %arg11[%c0_24, %c0_25] : memref<8x128xf32, #tpu.memory_space<vmem>>, vector<8x128xf32>
    tpu.vector_store %arg11[%c0_24, %c0_25], %31 {strides = array<i32>} : memref<8x128xf32, #tpu.memory_space<vmem>>, vector<8x128xf32>,
    return
  }
  func.func @transform_0(%arg0: i32) -> (i32, i32) {
    %c0_i32 = arith.constant 0 : i32
    %c0_i32_0 = arith.constant 0 : i32
    return %arg0, %c0_i32 : i32, i32
  }
  func.func @transform_1(%arg0: i32) -> (i32, i32) {
    %c0_i32 = arith.constant 0 : i32
    %c0_i32_0 = arith.constant 0 : i32
    return %arg0, %c0_i32 : i32, i32
  }
  func.func @transform_2(%arg0: i32) -> (i32, i32) {
    %c0_i32 = arith.constant 0 : i32
    %c0_i32_0 = arith.constant 0 : i32
    %c0_i32_1 = arith.constant 0 : i32
    return %c0_i32, %c0_i32_0 : i32, i32
  }
  func.func @transform_3(%arg0: i32) -> (i32, i32) {
    %c0_i32 = arith.constant 0 : i32
    %c0_i32_0 = arith.constant 0 : i32
    %c0_i32_1 = arith.constant 0 : i32
    return %c0_i32, %c0_i32_0 : i32, i32
  }
  func.func @transform_4(%arg0: i32) -> (i32, i32) {
    %c0_i32 = arith.constant 0 : i32
    %c0_i32_0 = arith.constant 0 : i32
    %c0_i32_1 = arith.constant 0 : i32
    return %c0_i32, %c0_i32_0 : i32, i32
  }
  func.func @transform_5(%arg0: i32) -> (i32, i32) {
    %c0_i32 = arith.constant 0 : i32
    %c0_i32_0 = arith.constant 0 : i32
    %c0_i32_1 = arith.constant 0 : i32
    return %c0_i32, %c0_i32_0 : i32, i32
  }
  func.func @transform_6(%arg0: i32) -> (i32, i32) {
    %c0_i32 = arith.constant 0 : i32
    %c0_i32_0 = arith.constant 0 : i32
    %c0_i32_1 = arith.constant 0 : i32
    return %c0_i32, %c0_i32_0 : i32, i32
  }
  func.func @transform_7(%arg0: i32) -> (i32, i32) {
    %c0_i32 = arith.constant 0 : i32
    %c0_i32_0 = arith.constant 0 : i32
    %c0_i32_1 = arith.constant 0 : i32
    return %c0_i32, %c0_i32_0 : i32, i32
  }
  func.func @transform_8(%arg0: i32) -> (i32, i32) {
    %c0_i32 = arith.constant 0 : i32
    %c0_i32_0 = arith.constant 0 : i32
    %c0_i32_1 = arith.constant 0 : i32
    return %c0_i32, %c0_i32_0 : i32, i32
  }
  func.func @transform_9(%arg0: i32) -> (i32, i32) {
    %c0_i32 = arith.constant 0 : i32
    %c0_i32_0 = arith.constant 0 : i32
    %c0_i32_1 = arith.constant 0 : i32
    return %c0_i32, %c0_i32_0 : i32, i32
  }
  func.func @transform_10(%arg0: i32) -> (i32, i32) {
    %c0_i32 = arith.constant 0 : i32
    %c0_i32_0 = arith.constant 0 : i32
    return %arg0, %c0_i32 : i32, i32
  }
}

</mosaic_0001>

<bundles_post_ra>
// kernel: general_network_forward.1
= control target key start
LH: loop header
LB: loop body
LE: loop exit
PB: predicated region body
PF: predicated region fallthrough
CT: control target
= control target key end

     0   :  { %s2012_s0 = inlined_call_operand.vmem [shape: bf16[8,384], index: 0, kind: input, shape index: {}]   ;;  %s2013_s1 = inlined_call_operand.vmem [shape: f32[8,128], index: 1, kind: input, shape index: {}]   ;;  %s2014_s2 = inlined_call_operand.vmem [shape: bf16[384,192], index: 2, kind: input, shape index: {}]   ;;  %s2015_s3 = inlined_call_operand.vmem [shape: f32[1,192], index: 3, kind: input, shape index: {}]   ;;  %s2016_s4 = inlined_call_operand.vmem [shape: bf16[192,256], index: 4, kind: input, shape index: {}]   ;;  %s2017_s5 = inlined_call_operand.vmem [shape: f32[1,256], index: 5, kind: input, shape index: {}]   ;;  %s2018_s6 = inlined_call_operand.vmem [shape: bf16[256,128], index: 6, kind: input, shape index: {}]   ;;  %s2019_s7 = inlined_call_operand.vmem [shape: f32[1,128], index: 7, kind: input, shape index: {}]   ;;  %s2020_s8 = inlined_call_operand.vmem [shape: bf16[128,128], index: 8, kind: input, shape index: {}]   ;;  %s2021_s9 = inlined_call_operand.vmem [shape: f32[1,128], index: 9, kind: input, shape index: {}]   ;;  %s2022_s10 = inlined_call_operand.hbm [shape: f32[8,128], index: 10, kind: output, shape index: {}]  }
   0x1   :  { %v955_v0 = vld [vmem:[%s2014_s2 + $0x70] sm:$0xf]  ;;  %v1298_v1 = vld [vmem:[%s2014_s2 + $0x74] sm:$0xf0]  ;;  %v947_v9 = vld [vmem:[%s2014_s2 + $0x60] sm:$0xf] }
   0x2   :  { %v1019_v2 = vld [vmem:[%s2014_s2 + $0xf0] sm:$0xf]  ;;  %v956_v3 = vor.u32 %v1298_v1, %v955_v0  ;;  %v1314_v4 = vld [vmem:[%s2014_s2 + $0xf4] sm:$0xf0]  ;;  %v1296_v10 = vld [vmem:[%s2014_s2 + $0x64] sm:$0xf0] }
   0x3   :  { %v1083_v5 = vld [vmem:[%s2014_s2 + $0x170] sm:$0xf]  ;;  %v1330_v6 = vld [vmem:[%s2014_s2 + $0x174] sm:$0xf0]  ;;  %v1020_v7 = vor.u32 %v1314_v4, %v1019_v2  ;;  %v1011_v11 = vld [vmem:[%s2014_s2 + $0xe0] sm:$0xf]  ;;  %v948_v12 = vor.u32 %v1296_v10, %v947_v9 }
   0x4   :  { %v1084_v8 = vor.u32 %v1330_v6, %v1083_v5  ;;  %344 = vmatpush.bf16.msra.mxu0 %v956_v3  ;;  %v1312_v13 = vld [vmem:[%s2014_s2 + $0xe4] sm:$0xf0]  ;;  %v1075_v14 = vld [vmem:[%s2014_s2 + $0x160] sm:$0xf]  ;;  %v939_v18 = vld [vmem:[%s2014_s2 + $0x50] sm:$0xf] }
   0x5   :  { %v1328_v15 = vld [vmem:[%s2014_s2 + $0x164] sm:$0xf0]  ;;  %357 = vmatpush.bf16.msra.mxu1 %v1020_v7  ;;  %v1012_v16 = vor.u32 %v1312_v13, %v1011_v11  ;;  %v1294_v19 = vld [vmem:[%s2014_s2 + $0x54] sm:$0xf0]  ;;  %v1003_v20 = vld [vmem:[%s2014_s2 + $0xd0] sm:$0xf] }
   0x6   :  { %370 = vmatpush.bf16.msra.mxu2 %v1084_v8  ;;  %v1076_v17 = vor.u32 %v1328_v15, %v1075_v14  ;;  %v1310_v21 = vld [vmem:[%s2014_s2 + $0xd4] sm:$0xf0]  ;;  %v1067_v22 = vld [vmem:[%s2014_s2 + $0x150] sm:$0xf]  ;;  %v940_v24 = vor.u32 %v1294_v19, %v939_v18  ;;  %v1297_v25 = vld [vmem:[%s2014_s2 + $0x74] sm:$0xf] }
   0x7   :  { %v1326_v23 = vld [vmem:[%s2014_s2 + $0x154] sm:$0xf0]  ;;  %v957_v26 = vld [vmem:[%s2014_s2 + $0x78] sm:$0xf0]  ;;  %v1004_v27 = vor.u32 %v1310_v21, %v1003_v20  ;;  %v931_v29 = vld [vmem:[%s2014_s2 + $0x40] sm:$0xf] }
   0x8   :  { %345 = vmatpush.bf16.msra.mxu0 %v948_v12  ;;  %v1068_v28 = vor.u32 %v1326_v23, %v1067_v22  ;;  %v1292_v30 = vld [vmem:[%s2014_s2 + $0x44] sm:$0xf0]  ;;  %v995_v31 = vld [vmem:[%s2014_s2 + $0xc0] sm:$0xf]  ;;  %v960_v32 = vor.u32 %v1297_v25, %v957_v26  ;;  %v1295_v36 = vld [vmem:[%s2014_s2 + $0x64] sm:$0xf] }
   0x9   :  { %358 = vmatpush.bf16.msra.mxu1 %v1012_v16  ;;  %v1308_v33 = vld [vmem:[%s2014_s2 + $0xc4] sm:$0xf0]  ;;  %v1059_v34 = vld [vmem:[%s2014_s2 + $0x140] sm:$0xf]  ;;  %v949_v37 = vld [vmem:[%s2014_s2 + $0x68] sm:$0xf0]  ;;  %v932_v38 = vor.u32 %v1292_v30, %v931_v29 }
   0xa   :  { %371 = vmatpush.bf16.msra.mxu2 %v1076_v17  ;;  %v1324_v35 = vld [vmem:[%s2014_s2 + $0x144] sm:$0xf0]  ;;  %383 = vmatpush.bf16.msra.mxu3 %v960_v32  ;;  %v923_v39 = vld [vmem:[%s2014_s2 + $0x30] sm:$0xf]  ;;  %v1290_v40 = vld [vmem:[%s2014_s2 + $0x34] sm:$0xf0]  ;;  %v952_v41 = vor.u32 %v1295_v36, %v949_v37  ;;  %v996_v42 = vor.u32 %v1308_v33, %v995_v31 }
   0xb   :  { %v1060_v43 = vor.u32 %v1324_v35, %v1059_v34  ;;  %v987_v44 = vld [vmem:[%s2014_s2 + $0xb0] sm:$0xf]  ;;  %v1306_v45 = vld [vmem:[%s2014_s2 + $0xb4] sm:$0xf0]  ;;  %v1293_v46 = vld [vmem:[%s2014_s2 + $0x54] sm:$0xf]  ;;  %v924_v51 = vor.u32 %v1290_v40, %v923_v39 }
   0xc   :  { %346 = vmatpush.bf16.msra.mxu0 %v940_v24  ;;  %v1051_v47 = vld [vmem:[%s2014_s2 + $0x130] sm:$0xf]  ;;  %v1322_v48 = vld [vmem:[%s2014_s2 + $0x134] sm:$0xf0]  ;;  %v941_v49 = vld [vmem:[%s2014_s2 + $0x58] sm:$0xf0]  ;;  %v988_v54 = vor.u32 %v1306_v45, %v987_v44 }
   0xd   :  { %359 = vmatpush.bf16.msra.mxu1 %v1004_v27  ;;  %v944_v50 = vor.u32 %v1293_v46, %v941_v49  ;;  %v1291_v52 = vld [vmem:[%s2014_s2 + $0x44] sm:$0xf]  ;;  %v933_v53 = vld [vmem:[%s2014_s2 + $0x48] sm:$0xf0]  ;;  %v1052_v55 = vor.u32 %v1322_v48, %v1051_v47  ;;  %v915_v56 = vld [vmem:[%s2014_s2 + $0x20] sm:$0xf] }
   0xe   :  { %372 = vmatpush.bf16.msra.mxu2 %v1068_v28  ;;  %384 = vmatpush.bf16.msra.mxu3 %v952_v41  ;;  %v1288_v57 = vld [vmem:[%s2014_s2 + $0x24] sm:$0xf0]  ;;  %v979_v58 = vld [vmem:[%s2014_s2 + $0xa0] sm:$0xf]  ;;  %v936_v62 = vor.u32 %v1291_v52, %v933_v53  ;;  %v1289_v0 = vld [vmem:[%s2014_s2 + $0x34] sm:$0xf] }
   0xf   :  { %v1304_v59 = vld [vmem:[%s2014_s2 + $0xa4] sm:$0xf0]  ;;  %v1043_v60 = vld [vmem:[%s2014_s2 + $0x120] sm:$0xf]  ;;  %v916_v63 = vor.u32 %v1288_v57, %v915_v56  ;;  %v925_v1 = vld [vmem:[%s2014_s2 + $0x38] sm:$0xf0] }
  0x10   :  { %347 = vmatpush.bf16.msra.mxu0 %v932_v38  ;;  %v1320_v61 = vld [vmem:[%s2014_s2 + $0x124] sm:$0xf0]  ;;  %v980_v2 = vor.u32 %v1304_v59, %v979_v58  ;;  %v907_v4 = vld [vmem:[%s2014_s2 + $0x10] sm:$0xf]  ;;  %v1286_v5 = vld [vmem:[%s2014_s2 + $0x14] sm:$0xf0]  ;;  %v928_v12 = vor.u32 %v1289_v0, %v925_v1 }
  0x11   :  { %360 = vmatpush.bf16.msra.mxu1 %v996_v42  ;;  %v1044_v3 = vor.u32 %v1320_v61, %v1043_v60  ;;  %v971_v6 = vld [vmem:[%s2014_s2 + $0x90] sm:$0xf]  ;;  %v1302_v7 = vld [vmem:[%s2014_s2 + $0x94] sm:$0xf0]  ;;  %v899_v10 = vld [vmem:[%s2014_s2] sm:$0xf]  ;;  %v908_v13 = vor.u32 %v1286_v5, %v907_v4 }
  0x12   :  { %373 = vmatpush.bf16.msra.mxu2 %v1060_v43  ;;  %385 = vmatpush.bf16.msra.mxu3 %v944_v50  ;;  %v1035_v8 = vld [vmem:[%s2014_s2 + $0x110] sm:$0xf]  ;;  %v1318_v9 = vld [vmem:[%s2014_s2 + $0x114] sm:$0xf0]  ;;  %v1284_v11 = vld [vmem:[%s2014_s2 + $0x4] sm:$0xf0]  ;;  %v972_v17 = vor.u32 %v1302_v7, %v971_v6 }
  0x13   :  { %v1287_v14 = vld [vmem:[%s2014_s2 + $0x24] sm:$0xf]  ;;  %v917_v15 = vld [vmem:[%s2014_s2 + $0x28] sm:$0xf0]  ;;  %v1036_v18 = vor.u32 %v1318_v9, %v1035_v8  ;;  %v963_v19 = vld [vmem:[%s2014_s2 + $0x80] sm:$0xf]  ;;  %v900_v30 = vor.u32 %v1284_v11, %v899_v10 }
  0x14   :  { %348 = vmatpush.bf16.msra.mxu0 %v924_v51  ;;  %v37_v16 = vld [vmem:[%s2012_s0] sm:$0xff]  ;;  %v1300_v20 = vld [vmem:[%s2014_s2 + $0x84] sm:$0xf0]  ;;  %v1313_v21 = vld [vmem:[%s2014_s2 + $0xf4] sm:$0xf]  ;;  %v920_v28 = vor.u32 %v1287_v14, %v917_v15 }
  0x15   :  { %361 = vmatpush.bf16.msra.mxu1 %v988_v54  ;;  %v1021_v22 = vld [vmem:[%s2014_s2 + $0xf8] sm:$0xf0]  ;;  %v1329_v23 = vld [vmem:[%s2014_s2 + $0x174] sm:$0xf]  ;;  %v38_v24 = vld [vmem:[%s2012_s0 + $0x8] sm:$0xf]  ;;  %v95_v29 = vunpack.c.l.b16 %v37_v16  ;;  %v96_v33 = vunpack.c.h.b16 %v37_v16  ;;  %v964_v34 = vor.u32 %v1300_v20, %v963_v19 }
  0x16   :  { %374 = vmatpush.bf16.msra.mxu2 %v1052_v55  ;;  %386 = vmatpush.bf16.msra.mxu3 %v936_v62  ;;  %v1085_v25 = vld [vmem:[%s2014_s2 + $0x178] sm:$0xf0]  ;;  %v1027_v26 = vld [vmem:[%s2014_s2 + $0x100] sm:$0xf]  ;;  %v1316_v27 = vld [vmem:[%s2014_s2 + $0x104] sm:$0xf0]  ;;  %v1024_v35 = vor.u32 %v1313_v21, %v1021_v22  ;;  %v97_v36 = vunpack.c.l.b16 %v38_v24 }
  0x17   :  { %v1285_v31 = vld [vmem:[%s2014_s2 + $0x14] sm:$0xf]  ;;  %v909_v32 = vld [vmem:[%s2014_s2 + $0x18] sm:$0xf0]  ;;  %v1088_v37 = vor.u32 %v1329_v23, %v1085_v25  ;;  %v1028_v38 = vor.u32 %v1316_v27, %v1027_v26  ;;  %v1311_v39 = vld [vmem:[%s2014_s2 + $0xe4] sm:$0xf]  ;;  %v98_v43 = vpack.c.b16 %v95_v29, %v95_v29  ;;  %v1690_v45 = vpack.c.b16 %v96_v33, %v96_v33 }
  0x18   :  { %349 = vmatpush.bf16.msra.mxu0 %v916_v63  ;;  %v1013_v40 = vld [vmem:[%s2014_s2 + $0xe8] sm:$0xf0]  ;;  %v1327_v41 = vld [vmem:[%s2014_s2 + $0x164] sm:$0xf]  ;;  %v912_v44 = vor.u32 %v1285_v31, %v909_v32  ;;  %v1698_v49 = vpack.c.b16 %v97_v36, %v97_v36  ;;  %v1147_v50 = vld [vmem:[%s2016_s4 + $0x70] sm:$0xf] }
  0x19   :  { %362 = vmatpush.bf16.msra.mxu1 %v980_v2  ;;  %v1077_v42 = vld [vmem:[%s2014_s2 + $0x168] sm:$0xf0]  ;;  %v1283_v46 = vld [vmem:[%s2014_s2 + $0x4] sm:$0xf]  ;;  %v1016_v48 = vor.u32 %v1311_v39, %v1013_v40  ;;  %v1309_v52 = vld [vmem:[%s2014_s2 + $0xd4] sm:$0xf] }
  0x1a   :  { %375 = vmatpush.bf16.msra.mxu2 %v1044_v3  ;;  %387 = vmatpush.bf16.msra.mxu3 %v928_v12  ;;  %v901_v47 = vld [vmem:[%s2014_s2 + $0x8] sm:$0xf0]  ;;  %v1080_v51 = vor.u32 %v1327_v41, %v1077_v42  ;;  %v1005_v53 = vld [vmem:[%s2014_s2 + $0xd8] sm:$0xf0]  ;;  %v1346_v54 = vld [vmem:[%s2016_s4 + $0x74] sm:$0xf0] }
  0x1b   :  { %v1325_v55 = vld [vmem:[%s2014_s2 + $0x154] sm:$0xf]  ;;  %v1069_v56 = vld [vmem:[%s2014_s2 + $0x158] sm:$0xf0]  ;;  %v904_v57 = vor.u32 %v1283_v46, %v901_v47  ;;  %v1148_v58 = vor.u32 %v1346_v54, %v1147_v50  ;;  %v1139_v59 = vld [vmem:[%s2016_s4 + $0x60] sm:$0xf]  ;;  %v1008_v61 = vor.u32 %v1309_v52, %v1005_v53 }
  0x1c   :  { %350 = vmatpush.bf16.msra.mxu0 %v908_v13  ;;  %v1344_v60 = vld [vmem:[%s2016_s4 + $0x64] sm:$0xf0] }
  0x1d   :  { %363 = vmatpush.bf16.msra.mxu1 %v972_v17 }
  0x1e   :  { %376 = vmatpush.bf16.msra.mxu2 %v1036_v18  ;;  %388 = vmatpush.bf16.msra.mxu3 %v920_v28 }
  0x20   :  { %351 = vmatpush.bf16.msra.mxu0 %v900_v30 }
  0x21   :  { %364 = vmatpush.bf16.msra.mxu1 %v964_v34 }
  0x22   :  { %377 = vmatpush.bf16.msra.mxu2 %v1028_v38  ;;  %389 = vmatpush.bf16.msra.mxu3 %v912_v44 }
  0x23   :  { %352 = vmatmul.bf16.vlgmr.msra.gmra.mxu0 %v98_v43 }
  0x24   :  { %396 = vmatpush.bf16.msrb.mxu0 %v1024_v35  ;;  %365 = vmatmul.bf16.vlgmr.msra.gmra.mxu1 %v1690_v45 }
  0x25   :  { %409 = vmatpush.bf16.msrb.mxu1 %v1088_v37  ;;  %378 = vmatmul.bf16.vlgmr.msra.gmra.mxu2 %v1698_v49 }
  0x28   :  { %397 = vmatpush.bf16.msrb.mxu0 %v1016_v48 }
  0x29   :  { %15 = vsyncpa [#allocation3], 0  ;;  %410 = vmatpush.bf16.msrb.mxu1 %v1080_v51  ;;  %v1072_v62 = vor.u32 %v1325_v55, %v1069_v56  ;;  %v1307_v63 = vld [vmem:[%s2014_s2 + $0xc4] sm:$0xf]  ;;  %v997_v0 = vld [vmem:[%s2014_s2 + $0xc8] sm:$0xf0]  ;;  %580 = vmatpush.bf16.msrb.mxu2 %v1148_v58  ;;  %v1140_v3 = vor.u32 %v1344_v60, %v1139_v59 }
  0x2a   :  { %390 = vmatpush.bf16.msra.mxu3 %v904_v57  ;;  %v1323_v1 = vld [vmem:[%s2014_s2 + $0x144] sm:$0xf]  ;;  %v1061_v2 = vld [vmem:[%s2014_s2 + $0x148] sm:$0xf0]  ;;  %v1131_v4 = vld [vmem:[%s2016_s4 + $0x50] sm:$0xf]  ;;  %v1000_v6 = vor.u32 %v1307_v63, %v997_v0 }
  0x2b   :  { %v1342_v5 = vld [vmem:[%s2016_s4 + $0x54] sm:$0xf0]  ;;  %v1064_v7 = vor.u32 %v1323_v1, %v1061_v2  ;;  %v1305_v8 = vld [vmem:[%s2014_s2 + $0xb4] sm:$0xf]  ;;  %v989_v9 = vld [vmem:[%s2014_s2 + $0xb8] sm:$0xf0] }
  0x2c   :  { %398 = vmatpush.bf16.msrb.mxu0 %v1008_v61  ;;  %v1321_v10 = vld [vmem:[%s2014_s2 + $0x134] sm:$0xf]  ;;  %v1053_v11 = vld [vmem:[%s2014_s2 + $0x138] sm:$0xf0]  ;;  %v1132_v12 = vor.u32 %v1342_v5, %v1131_v4  ;;  %v1123_v13 = vld [vmem:[%s2016_s4 + $0x40] sm:$0xf]  ;;  %v992_v15 = vor.u32 %v1305_v8, %v989_v9 }
  0x2d   :  { %411 = vmatpush.bf16.msrb.mxu1 %v1072_v62  ;;  %391 = vmatmul.bf16.vlgmr.msra.gmra.mxu3 %v98_v43  ;;  %v1340_v14 = vld [vmem:[%s2016_s4 + $0x44] sm:$0xf0]  ;;  %v1056_v16 = vor.u32 %v1321_v10, %v1053_v11  ;;  %v1303_v17 = vld [vmem:[%s2014_s2 + $0xa4] sm:$0xf]  ;;  %v981_v18 = vld [vmem:[%s2014_s2 + $0xa8] sm:$0xf0] }
  0x2e   :  { %581 = vmatpush.bf16.msrb.mxu2 %v1140_v3  ;;  %v1319_v19 = vld [vmem:[%s2014_s2 + $0x124] sm:$0xf]  ;;  %v1045_v20 = vld [vmem:[%s2014_s2 + $0x128] sm:$0xf0]  ;;  %v1124_v21 = vor.u32 %v1340_v14, %v1123_v13  ;;  %v984_v22 = vor.u32 %v1303_v17, %v981_v18  ;;  %v1301_v24 = vld [vmem:[%s2014_s2 + $0x94] sm:$0xf] }
  0x2f   :  { %v1048_v23 = vor.u32 %v1319_v19, %v1045_v20  ;;  %v973_v25 = vld [vmem:[%s2014_s2 + $0x98] sm:$0xf0]  ;;  %v1317_v26 = vld [vmem:[%s2014_s2 + $0x114] sm:$0xf]  ;;  %v1299_v30 = vld [vmem:[%s2014_s2 + $0x84] sm:$0xf] }
  0x30   :  { %399 = vmatpush.bf16.msrb.mxu0 %v1000_v6  ;;  %v1037_v27 = vld [vmem:[%s2014_s2 + $0x118] sm:$0xf0]  ;;  %v976_v28 = vor.u32 %v1301_v24, %v973_v25  ;;  %v965_v31 = vld [vmem:[%s2014_s2 + $0x88] sm:$0xf0]  ;;  %v1315_v32 = vld [vmem:[%s2014_s2 + $0x104] sm:$0xf] }
  0x31   :  { %412 = vmatpush.bf16.msrb.mxu1 %v1064_v7  ;;  %v1040_v29 = vor.u32 %v1317_v26, %v1037_v27  ;;  %v1029_v33 = vld [vmem:[%s2014_s2 + $0x108] sm:$0xf0]  ;;  %v968_v34 = vor.u32 %v1299_v30, %v965_v31  ;;  %v1115_v36 = vld [vmem:[%s2016_s4 + $0x30] sm:$0xf]  ;;  %v1338_v37 = vld [vmem:[%s2016_s4 + $0x34] sm:$0xf0] }
  0x32   :  { %582 = vmatpush.bf16.msrb.mxu2 %v1132_v12  ;;  %v1032_v35 = vor.u32 %v1315_v32, %v1029_v33  ;;  %v1116_v38 = vor.u32 %v1338_v37, %v1115_v36  ;;  %v1107_v39 = vld [vmem:[%s2016_s4 + $0x20] sm:$0xf]  ;;  %v1336_v40 = vld [vmem:[%s2016_s4 + $0x24] sm:$0xf0]  ;;  %v1099_v42 = vld [vmem:[%s2016_s4 + $0x10] sm:$0xf] }
  0x33   :  { %v1108_v41 = vor.u32 %v1336_v40, %v1107_v39  ;;  %v1334_v43 = vld [vmem:[%s2016_s4 + $0x14] sm:$0xf0]  ;;  %v1091_v48 = vld [vmem:[%s2016_s4] sm:$0xf]  ;;  %v1352_v52 = vld [vmem:[%s2016_s4 + $0xa4] sm:$0xf0] }
  0x34   :  { %400 = vmatpush.bf16.msrb.mxu0 %v992_v15  ;;  %v1100_v44 = vor.u32 %v1334_v43, %v1099_v42  ;;  %v1354_v46 = vld [vmem:[%s2016_s4 + $0xb4] sm:$0xf0]  ;;  %v1171_v51 = vld [vmem:[%s2016_s4 + $0xa0] sm:$0xf]  ;;  %v1163_v54 = vld [vmem:[%s2016_s4 + $0x90] sm:$0xf] }
  0x35   :  { %413 = vmatpush.bf16.msrb.mxu1 %v1056_v16  ;;  %v1172_v53 = vor.u32 %v1352_v52, %v1171_v51  ;;  %v1350_v55 = vld [vmem:[%s2016_s4 + $0x94] sm:$0xf0]  ;;  %v1155_v57 = vld [vmem:[%s2016_s4 + $0x80] sm:$0xf]  ;;  %v1348_v58 = vld [vmem:[%s2016_s4 + $0x84] sm:$0xf0] }
  0x36   :  { %583 = vmatpush.bf16.msrb.mxu2 %v1124_v21  ;;  %v1164_v56 = vor.u32 %v1350_v55, %v1163_v54  ;;  %v1345_v59 = vld [vmem:[%s2016_s4 + $0x74] sm:$0xf]  ;;  %v1149_v60 = vld [vmem:[%s2016_s4 + $0x78] sm:$0xf0]  ;;  %v1156_v61 = vor.u32 %v1348_v58, %v1155_v57  ;;  %v87_v63 = vld [vmem:[%s2015_s3] sm:$0x3] }
  0x37   :  { %v1152_v62 = vor.u32 %v1345_v59, %v1149_v60  ;;  %v89_v0 = vperm.slane %v87_v63, 0  ;;  %v1343_v1 = vld [vmem:[%s2016_s4 + $0x64] sm:$0xf]  ;;  %v1141_v2 = vld [vmem:[%s2016_s4 + $0x68] sm:$0xf0]  ;;  %vm576_vm0 = vcmask 523264  }
  0x38   :  { %401 = vmatpush.bf16.msrb.mxu0 %v984_v22  ;;  %v1144_v3 = vor.u32 %v1343_v1, %v1141_v2  ;;  %v1341_v7 = vld [vmem:[%s2016_s4 + $0x54] sm:$0xf]  ;;  %v1133_v8 = vld [vmem:[%s2016_s4 + $0x58] sm:$0xf0]  ;;  %v1339_v11 = vld [vmem:[%s2016_s4 + $0x44] sm:$0xf] }
  0x39   :  { %414 = vmatpush.bf16.msrb.mxu1 %v1048_v23  ;;  %v1136_v9 = vor.u32 %v1341_v7, %v1133_v8  ;;  %v1125_v12 = vld [vmem:[%s2016_s4 + $0x48] sm:$0xf0]  ;;  %v1337_v18 = vld [vmem:[%s2016_s4 + $0x34] sm:$0xf]  ;;  %v1117_v19 = vld [vmem:[%s2016_s4 + $0x38] sm:$0xf0] }
  0x3a   :  { %584 = vmatpush.bf16.msrb.mxu2 %v1116_v38  ;;  %v1128_v13 = vor.u32 %v1339_v11, %v1125_v12  ;;  %v1120_v20 = vor.u32 %v1337_v18, %v1117_v19  ;;  %v1335_v21 = vld [vmem:[%s2016_s4 + $0x24] sm:$0xf]  ;;  %v1109_v22 = vld [vmem:[%s2016_s4 + $0x28] sm:$0xf0]  ;;  %v1333_v25 = vld [vmem:[%s2016_s4 + $0x14] sm:$0xf] }
  0x3b   :  { %v1112_v24 = vor.u32 %v1335_v21, %v1109_v22  ;;  %v1101_v26 = vld [vmem:[%s2016_s4 + $0x18] sm:$0xf0]  ;;  %v1331_v31 = vld [vmem:[%s2016_s4 + $0x4] sm:$0xf]  ;;  %v1093_v32 = vld [vmem:[%s2016_s4 + $0x8] sm:$0xf0] }
  0x3c   :  { %402 = vmatpush.bf16.msrb.mxu0 %v976_v28  ;;  %v1353_v42 = vld [vmem:[%s2016_s4 + $0xb4] sm:$0xf]  ;;  %v1181_v43 = vld [vmem:[%s2016_s4 + $0xb8] sm:$0xf0]  ;;  %v1347_v54 = vld [vmem:[%s2016_s4 + $0x84] sm:$0xf] }
  0x3d   :  { %415 = vmatpush.bf16.msrb.mxu1 %v1040_v29  ;;  %v1104_v29 = vor.u32 %v1333_v25, %v1101_v26  ;;  %v1349_v51 = vld [vmem:[%s2016_s4 + $0x94] sm:$0xf]  ;;  %v1165_v52 = vld [vmem:[%s2016_s4 + $0x98] sm:$0xf0]  ;;  %v1157_v55 = vld [vmem:[%s2016_s4 + $0x88] sm:$0xf0] }
  0x3e   :  { %585 = vmatpush.bf16.msrb.mxu2 %v1108_v41  ;;  %v1362_v57 = vld [vmem:[%s2018_s6 + $0x38] sm:$0xff]  ;;  %v1361_v58 = vld [vmem:[%s2018_s6 + $0x30] sm:$0xff]  ;;  %v1360_v59 = vld [vmem:[%s2018_s6 + $0x28] sm:$0xff]  ;;  %s888_s19 = sshll.u32 %s2022_s10, 4  ;;  %s889_s19 = int_to_ptr.hbm [resolvable:$true] %s888_s19 }
  0x3f   :  { %v1359_v60 = vld [vmem:[%s2018_s6 + $0x20] sm:$0xff]  ;;  %v1370_v2 = vld [vmem:[%s2018_s6 + $0x78] sm:$0xff]  ;;  %v1365_v12 = vld [vmem:[%s2018_s6 + $0x50] sm:$0xff] }
  0x40   :  { %403 = vmatpush.bf16.msrb.mxu0 %v968_v34  ;;  %v1096_v34 = vor.u32 %v1331_v31, %v1093_v32  ;;  %v1367_v7 = vld [vmem:[%s2018_s6 + $0x60] sm:$0xff]  ;;  %v1366_v8 = vld [vmem:[%s2018_s6 + $0x58] sm:$0xff] }
  0x41   :  { %416 = vmatpush.bf16.msrb.mxu1 %v1032_v35  ;;  %v90_v35 = vperm.slane %v87_v63, 1  ;;  %v1356_v63 = vld [vmem:[%s2018_s6 + $0x8] sm:$0xff]  ;;  %v1375_v31 = vld [vmem:[%s2020_s8 + $0x20] sm:$0xff]  ;;  %v1374_v32 = vld [vmem:[%s2020_s8 + $0x18] sm:$0xff] }
  0x42   :  { %586 = vmatpush.bf16.msrb.mxu2 %v1100_v44 }
  0x43   :  { %404 = vmatmul.bf16.vlgmr.msrb.gmra.mxu0 %v1690_v45  ;;  %v1179_v45 = vld [vmem:[%s2016_s4 + $0xb0] sm:$0xf] }
  0x44   :  { %417 = vmatmul.bf16.vlgmr.msrb.gmra.mxu1 %v1698_v49  ;;  %v1180_v47 = vor.u32 %v1354_v46, %v1179_v45  ;;  %v1332_v49 = vld [vmem:[%s2016_s4 + $0x4] sm:$0xf0]  ;;  %v1184_v46 = vor.u32 %v1353_v42, %v1181_v43 }
  0x45   :  { %v1092_v50 = vor.u32 %v1332_v49, %v1091_v48  ;;  %v1351_v48 = vld [vmem:[%s2016_s4 + $0xa4] sm:$0xf]  ;;  %v1173_v49 = vld [vmem:[%s2016_s4 + $0xa8] sm:$0xf0]  ;;  %768 = vmatpush.bf16.msra.mxu1 %v1362_v57 }
  0x46   :  { %597 = vmatpush.bf16.msrb.mxu3 %v1180_v47 }
  0x47   :  { %587 = vmatpush.bf16.msrb.mxu2 %v1092_v50  ;;  %v1176_v50 = vor.u32 %v1351_v48, %v1173_v49 }
  0x49   :  { %769 = vmatpush.bf16.msra.mxu1 %v1361_v58 }
  0x4a   :  { %598 = vmatpush.bf16.msrb.mxu3 %v1172_v53  ;;  %v1168_v53 = vor.u32 %v1349_v51, %v1165_v52 }
  0x4b   :  { %781 = vmatpush.bf16.msra.mxu2 %v1370_v2 }
  0x4d   :  { %770 = vmatpush.bf16.msra.mxu1 %v1360_v59 }
  0x4e   :  { %599 = vmatpush.bf16.msrb.mxu3 %v1164_v56  ;;  %v1160_v56 = vor.u32 %v1347_v54, %v1157_v55 }
  0x51   :  { %771 = vmatpush.bf16.msra.mxu1 %v1359_v60 }
  0x52   :  { %600 = vmatpush.bf16.msrb.mxu3 %v1156_v61  ;;  %v1358_v61 = vld [vmem:[%s2018_s6 + $0x18] sm:$0xff] }
  0x55   :  { %772 = vmatpush.bf16.msra.mxu1 %v1358_v61 }
  0x56   :  { %606 = vmatpush.bf16.msra.mxu3 %v1152_v62  ;;  %v1357_v62 = vld [vmem:[%s2018_s6 + $0x10] sm:$0xff] }
  0x59   :  { %773 = vmatpush.bf16.msra.mxu1 %v1357_v62 }
  0x5a   :  { %607 = vmatpush.bf16.msra.mxu3 %v1144_v3  ;;  %v1369_v3 = vld [vmem:[%s2018_s6 + $0x70] sm:$0xff] }
  0x5b   :  { %782 = vmatpush.bf16.msra.mxu2 %v1369_v3 }
  0x5d   :  { %774 = vmatpush.bf16.msra.mxu1 %v1356_v63 }
  0x5e   :  { %608 = vmatpush.bf16.msra.mxu3 %v1136_v9 }
  0x62   :  { %609 = vmatpush.bf16.msra.mxu3 %v1128_v13 }
  0x66   :  { %610 = vmatpush.bf16.msra.mxu3 %v1120_v20 }
  0x6a   :  { %611 = vmatpush.bf16.msra.mxu3 %v1112_v24 }
  0x6e   :  { %612 = vmatpush.bf16.msra.mxu3 %v1104_v29  ;;  %v1377_v29 = vld [vmem:[%s2020_s8 + $0x30] sm:$0xff] }
  0x72   :  { %613 = vmatpush.bf16.msra.mxu3 %v1096_v34  ;;  %v1373_v34 = vld [vmem:[%s2020_s8 + $0x10] sm:$0xff] }
  0xa0   :  { %v353_v4 = vpop.f32.mrf.mxu0 }
  0xa1   :  { %v354_v5 = vadd.f32 %v353_v4, %v89_v0  ;;  %v366_v6 = vpop.f32.mrf.mxu1  ;;  %v1355_v0 = vld [vmem:[%s2018_s6] sm:$0xff] }
  0xa2   :  { %775 = vmatpush.bf16.msra.mxu1 %v1355_v0 }
  0xa3   :  { %v367_v10 = vadd.f32 %v366_v6, %v354_v5  ;;  %v1368_v5 = vld [vmem:[%s2018_s6 + $0x68] sm:$0xff]  ;;  %v450_v6 = vld [vmem:[%s2017_s5] sm:$0x3] }
  0xa4   :  { %783 = vmatpush.bf16.msra.mxu2 %v1368_v5  ;;  %v452_v9 = vperm.slane %v450_v6, 0  ;;  %v453_v21 = vperm.slane %v450_v6, 1 }
  0xa8   :  { %v379_v14 = vpop.f32.mrf.mxu2  ;;  %v355_v15 = vpop.f32.mrf.mxu0  ;;  %784 = vmatpush.bf16.msra.mxu2 %v1367_v7 }
  0xa9   :  { %v380_v16 = vadd.f32 %v379_v14, %v367_v10  ;;  %v368_v17 = vpop.f32.mrf.mxu1  ;;  %v1364_v14 = vld [vmem:[%s2018_s6 + $0x48] sm:$0xff] }
  0xab   :  { %1382 = vtanh.f32 %v380_v16  ;;  %v1363_v16 = vld [vmem:[%s2018_s6 + $0x40] sm:$0xff] }
  0xac   :  { %785 = vmatpush.bf16.msra.mxu2 %v1366_v8 }
  0xb0   :  { %v392_v23 = vpop.f32.mrf.mxu3  ;;  %v381_v27 = vpop.f32.mrf.mxu2  ;;  %786 = vmatpush.bf16.msra.mxu2 %v1365_v12 }
  0xb1   :  { %v1383_v28 = vpop.eup %1382  ;;  %v393_v36 = vadd.f32 %v392_v23, %v90_v35 }
  0xb2   :  { %v424_v30 = vpack.c.bf16 %v1383_v28, %v1383_v28  ;;  %v1378_v28 = vld [vmem:[%s2020_s8 + $0x38] sm:$0xff] }
  0xb3   :  { %864 = vmatpush.bf16.msra.mxu0 %v1378_v28 }
  0xb4   :  { %588 = vmatmul.bf16.vlgmr.msrb.gmra.mxu2 %v424_v30 }
  0xb5   :  { %787 = vmatpush.bf16.msra.mxu2 %v1364_v14 }
  0xb7   :  { %865 = vmatpush.bf16.msra.mxu0 %v1377_v29 }
  0xb8   :  { %v394_v33 = vpop.f32.mrf.mxu3 }
  0xb9   :  { %788 = vmatpush.bf16.msra.mxu2 %v1363_v16 }
  0xc0   :  { %v405_v37 = vpop.f32.mrf.mxu0 }
  0xc1   :  { %v406_v38 = vadd.f32 %v405_v37, %v393_v36  ;;  %v418_v39 = vpop.f32.mrf.mxu1  ;;  %v1372_v36 = vld [vmem:[%s2020_s8 + $0x8] sm:$0xff]  ;;  %v1371_v37 = vld [vmem:[%s2020_s8] sm:$0xff] }
  0xc3   :  { %v419_v40 = vadd.f32 %v418_v39, %v406_v38  ;;  %v1380_v38 = vld [vmem:[%s2019_s7] ss:$0 sm:$0xff] }
  0xc5   :  { %1384 = vtanh.f32 %v419_v40 }
  0xc8   :  { %v407_v41 = vpop.f32.mrf.mxu0 }
  0xc9   :  { %v420_v44 = vpop.f32.mrf.mxu1 }
  0xcb   :  { %v1385_v45 = vpop.eup %1384 }
  0xcc   :  { %v425_v47 = vpack.c.bf16 %v1385_v45, %v1385_v45  ;;  %v1381_v45 = vld [vmem:[%s2021_s9] ss:$0 sm:$0xff] }
  0xce   :  { %1185 = vmatmul.msk.bf16.vlgmr.msrb.gmra.mxu3 %vm576_vm0, %v425_v47 }
  0xcf   :  { %623 = vmatpush.bf16.msrb.mxu3 %v1184_v46  ;;  %v877_v46 = vld [vmem:[%s2013_s1] sm:$0xff] }
  0xd0   :  { %vm878_vm1 = vcmp.eq.f32.partialorder %v877_v46, 0.0 }
  0xd3   :  { %624 = vmatpush.bf16.msrb.mxu3 %v1176_v50 }
  0xd7   :  { %625 = vmatpush.bf16.msrb.mxu3 %v1168_v53 }
  0xdb   :  { %626 = vmatpush.bf16.msrb.mxu3 %v1160_v56 }
  0xde   :  { %614 = vmatmul.bf16.vlgmr.msra.gmra.mxu3 %v424_v30  ;;  %v1376_v30 = vld [vmem:[%s2020_s8 + $0x28] sm:$0xff]  ;;  %s1418_s8 = smov [#allocation2]  }
  0xdf   :  { %866 = vmatpush.bf16.msra.mxu0 %v1376_v30  ;;  %s886_s5 = sshll.u32 %s1418_s8, 4  ;;  %s887_s5 = int_to_ptr.vmem [resolvable:$true] %s886_s5 }
  0xe3   :  { %867 = vmatpush.bf16.msra.mxu0 %v1375_v31 }
  0xe7   :  { %868 = vmatpush.bf16.msra.mxu0 %v1374_v32 }
  0xeb   :  { %869 = vmatpush.bf16.msra.mxu0 %v1373_v34 }
  0xee   :  { %1186 = vmatmul.msk.bf16.vlgmr.msrb.gmra.mxu3 %vm576_vm0, %v425_v47 }
  0xef   :  { %870 = vmatpush.bf16.msra.mxu0 %v1372_v36 }
  0xf3   :  { %871 = vmatpush.bf16.msra.mxu0 %v1371_v37 }
 0x137   :  { %v589_v1 = vpop.f32.mrf.mxu2 }
 0x138   :  { %v590_v10 = vadd.f32 %v589_v1, %v452_v9 }
 0x13f   :  { %v591_v4 = vpop.f32.mrf.mxu2 }
 0x151   :  { %v602_v11 = vpop.f32.mrf.mxu3 }
 0x152   :  { %v603_v13 = vadd.f32 %v602_v11, %v590_v10 }
 0x154   :  { %1386 = vtanh.f32 %v603_v13 }
 0x159   :  { %v604_v15 = vpop.f32.mrf.mxu3 }
 0x15a   :  { %v1387_v17 = vpop.eup %1386 }
 0x15b   :  { %v634_v18 = vpack.c.bf16 %v1387_v17, %v1387_v17 }
 0x15d   :  { %776 = vmatmul.bf16.vlgmr.msra.gmra.mxu1 %v634_v18 }
 0x161   :  { %v615_v19 = vpop.f32.mrf.mxu3 }
 0x162   :  { %v616_v22 = vadd.f32 %v615_v19, %v453_v21 }
 0x169   :  { %v617_v20 = vpop.f32.mrf.mxu3 }
 0x171   :  { %v628_v23 = vpop.f32.mrf.mxu3 }
 0x172   :  { %v629_v24 = vadd.f32 %v628_v23, %v616_v22 }
 0x174   :  { %1388 = vtanh.f32 %v629_v24 }
 0x179   :  { %v630_v25 = vpop.f32.mrf.mxu3 }
 0x17a   :  { %v1389_v26 = vpop.eup %1388 }
 0x17b   :  { %v635_v27 = vpack.c.bf16 %v1389_v26, %v1389_v26 }
 0x17d   :  { %789 = vmatmul.bf16.vlgmr.msra.gmra.mxu2 %v635_v27 }
 0x1da   :  { %v777_v33 = vpop.f32.mrf.mxu1 }
 0x1db   :  { %v778_v39 = vadd.f32 %v1380_v38, %v777_v33 }
 0x1e2   :  { %v779_v35 = vpop.f32.mrf.mxu1 }
 0x200   :  { %v790_v40 = vpop.f32.mrf.mxu2 }
 0x201   :  { %v791_v41 = vadd.f32 %v790_v40, %v778_v39 }
 0x203   :  { %1390 = vtanh.f32 %v791_v41 }
 0x208   :  { %v792_v42 = vpop.f32.mrf.mxu2 }
 0x209   :  { %v1391_v43 = vpop.eup %1390 }
 0x20a   :  { %v795_v44 = vpack.c.bf16 %v1391_v43, %v1391_v43 }
 0x20c   :  { %872 = vmatmul.bf16.vlgmr.msra.gmra.mxu0 %v795_v44 }
 0x289   :  { %v873_v47 = vpop.f32.mrf.mxu0 }
 0x28a   :  { %v874_v48 = vadd.f32 %v1381_v45, %v873_v47 }
 0x28c   :  { %v879_v49 = vsel %vm878_vm1, -1000000.0, %v874_v48 }
 0x28d   :  { %880 = vst [vmem:[#allocation2] sm:$0xff] %v879_v49 }
 0x28e   :  { %891 = dma.vmem_to_hbm [thread:$0]  %s887_s5, 128, %s889_s19, [#allocation3]  }
 0x291   :  { %v875_v50 = vpop.f32.mrf.mxu0 }
 0x292   :  { %1416 = dma.done.wait [#allocation3], 128  }
 0x293   :  { %1417 = vsyncadd [#allocation3], 4294967168 }
 0x294   :  { %896 = vsyncpa [#allocation3], 1 }

</bundles_post_ra>
